<compile_context>
chip_gen: v5e
topology: v5e:2x2
jax: 0.10.0
libtpu: 0.0.40
codegen_flags: <defaults>
</compile_context>

<pallas_src>
import jax
import jax.numpy as jnp
from jax.experimental import pallas as pl
from jax.experimental.pallas import tpu as pltpu


def mlp_kernel(x_ref, w1_ref, b1_ref, w2_ref, b2_ref, o_ref):
    # Two MXU matmuls (f32 accumulation) + VPU bias-add / relu.
    x = x_ref[...].astype(w1_ref.dtype)                       # in-kernel cast
    h = jnp.dot(x, w1_ref[...],
                preferred_element_type=jnp.float32)           # (TB, Hp) f32 acc
    h = jnp.maximum(h + b1_ref[...], 0.0)                     # bias + relu in f32
    h = h.astype(w2_ref.dtype)                                # back to MXU dtype
    y = jnp.dot(h, w2_ref[...],
                preferred_element_type=jnp.float32)           # (TB, O) f32 acc
    o_ref[...] = (y + b2_ref[...]).astype(o_ref.dtype)


def _round_up(v, m):
    return (v + m - 1) // m * m


def prepare_params(w1, b1, w2, b2, *, use_bf16=True):
    """One-time padding/casting of the weights (hoisted out of the call path).

    w1: (F, H), b1: (1, H), w2: (H, O), b2: (1, O)  -- all f32.
    Hidden dim is zero-padded 200 -> 256 (exact: relu(0)=0 and zero rows of w2
    contribute nothing). Output dim is NOT padded.
    """
    F, H = w1.shape
    O = w2.shape[1]
    Hp = _round_up(H, 128)
    mm = jnp.bfloat16 if use_bf16 else jnp.float32
    w1p = jnp.zeros((F, Hp), mm).at[:, :H].set(w1.astype(mm))
    b1p = jnp.zeros((1, Hp), jnp.float32).at[:, :H].set(b1.reshape(1, H))
    w2p = jnp.zeros((Hp, O), mm).at[:H, :].set(w2.astype(mm))
    b2p = b2.reshape(1, O).astype(jnp.float32)
    return (w1p, b1p, w2p, b2p)


def net_forward(x, params, *, block_b=1024):
    """Forward pass of Net. x: (B, F) f32, params from prepare_params()."""
    w1p, b1p, w2p, b2p = params
    B, F = x.shape
    Hp = w1p.shape[1]
    O = w2p.shape[1]

    # Batch tile: multiple of 8 sublanes, at most block_b, and small enough
    # that the grid has >=2 steps when B allows it (v7x dual-TensorCore).
    half = _round_up(max(pl.cdiv(B, 2), 1), 8)
    TB = max(8, min(_round_up(block_b, 8), half))
    grid = (pl.cdiv(B, TB),)                     # ragged last block is fine

    w_bytes = w1p.dtype.itemsize
    cost = pl.CostEstimate(
        flops=2 * B * (F * Hp + Hp * O),
        transcendentals=0,
        bytes_accessed=B * F * x.dtype.itemsize + B * O * 4
                       + (F * Hp + Hp * O) * w_bytes + (Hp + O) * 4,
    )

    out = pl.pallas_call(
        mlp_kernel,
        out_shape=jax.ShapeDtypeStruct((B, O), jnp.float32),
        grid=grid,
        in_specs=[
            pl.BlockSpec((TB, F), lambda i: (i, 0)),    # x marches over batch
            pl.BlockSpec((F, Hp), lambda i: (0, 0)),    # weights: VMEM-resident
            pl.BlockSpec((1, Hp), lambda i: (0, 0)),
            pl.BlockSpec((Hp, O), lambda i: (0, 0)),
            pl.BlockSpec((1, O), lambda i: (0, 0)),
        ],
        out_specs=pl.BlockSpec((TB, O), lambda i: (i, 0)),
        compiler_params=pltpu.CompilerParams(
            dimension_semantics=("parallel",),          # batch axis independent
        ),
        cost_estimate=cost,
    )(x, w1p, b1p, w2p, b2p)

    return out


def init_params(key, n_feature, n_hidden, n_output):
    """Deterministic init mimicking PyTorch nn.Linear (uniform +-1/sqrt(fan_in))."""
    k1, k2, k3, k4 = jax.random.split(key, 4)
    lim1 = 1.0 / jnp.sqrt(jnp.float32(n_feature))
    lim2 = 1.0 / jnp.sqrt(jnp.float32(n_hidden))
    w1 = jax.random.uniform(k1, (n_feature, n_hidden), jnp.float32, -lim1, lim1)
    b1 = jax.random.uniform(k2, (1, n_hidden), jnp.float32, -lim1, lim1)
    w2 = jax.random.uniform(k3, (n_hidden, n_output), jnp.float32, -lim2, lim2)
    b2 = jax.random.uniform(k4, (1, n_output), jnp.float32, -lim2, lim2)
    return w1, b1, w2, b2


def _ref_f32(x, w1, b1, w2, b2):
    hp = jax.lax.Precision.HIGHEST
    h = jnp.maximum(jnp.dot(x, w1, precision=hp) + b1, 0.0)
    return jnp.dot(h, w2, precision=hp) + b2


def _ref_bf16(x, w1, b1, w2, b2):
    # Matches the kernel's bf16-operand / f32-accumulate arithmetic.
    h = jnp.dot(x.astype(jnp.bfloat16), w1.astype(jnp.bfloat16),
                preferred_element_type=jnp.float32) + b1
    h = jnp.maximum(h, 0.0).astype(jnp.bfloat16)
    return jnp.dot(h, w2.astype(jnp.bfloat16),
                   preferred_element_type=jnp.float32) + b2


if __name__ == "__main__":
    key = jax.random.PRNGKey(0)
    kx, kx2, kp = jax.random.split(key, 3)

    n_feature, n_hidden, n_output = 32, 200, 4
    w1, b1, w2, b2 = init_params(kp, n_feature, n_hidden, n_output)

    params_bf16 = prepare_params(w1, b1, w2, b2, use_bf16=True)
    params_f32 = prepare_params(w1, b1, w2, b2, use_bf16=False)

    # --- case 1: tiny batch, bf16 MXU operands (default fast path) ---
    batch = 8
    x = jax.random.normal(kx, (batch, n_feature), dtype=jnp.float32)
    out_bf16 = net_forward(x, params_bf16)
    jax.block_until_ready(out_bf16)
    assert out_bf16.shape == (batch, n_output)
    assert jnp.allclose(out_bf16, _ref_bf16(x, w1, b1, w2, b2), atol=2e-3, rtol=2e-3)
    assert jnp.allclose(out_bf16, _ref_f32(x, w1, b1, w2, b2), atol=3e-2, rtol=3e-2)

    # --- case 2: ragged multi-tile batch grid, f32 operands (exact parity) ---
    batch2 = 300
    x2 = jax.random.normal(kx2, (batch2, n_feature), dtype=jnp.float32)
    out_f32 = net_forward(x2, params_f32)
    jax.block_until_ready(out_f32)
    assert out_f32.shape == (batch2, n_output)
    assert jnp.allclose(out_f32, _ref_f32(x2, w1, b1, w2, b2), atol=1e-4, rtol=1e-4)

    print("KERNEL_OK")
</pallas_src>

<mosaic_0001>
module attributes {stable_mosaic.version = 11 : i64} {
  func.func @mlp_kernel(%arg0: i32, %arg1: memref<8x32xf32, #tpu.memory_space<vmem>>, %arg2: memref<32x256xbf16, #tpu.memory_space<vmem>>, %arg3: memref<1x256xf32, #tpu.memory_space<vmem>>, %arg4: memref<256x4xbf16, #tpu.memory_space<vmem>>, %arg5: memref<1x4xf32, #tpu.memory_space<vmem>>, %arg6: memref<8x4xf32, #tpu.memory_space<vmem>>) attributes {dimension_semantics = [#tpu.dimension_semantics<parallel>], iteration_bounds = array<i64: 1>, scalar_prefetch = 0 : i64, scratch_operands = 0 : i64, tpu.core_type = #tpu.core_type<tc>, window_params = [{transform_indices = @transform_0, window_bounds = array<i64: 8, 32>}, {pipeline_mode = #tpu.pipeline_mode<synchronous>, transform_indices = @transform_1, window_bounds = array<i64: 32, 256>}, {pipeline_mode = #tpu.pipeline_mode<synchronous>, transform_indices = @transform_2, window_bounds = array<i64: 1, 256>}, {pipeline_mode = #tpu.pipeline_mode<synchronous>, transform_indices = @transform_3, window_bounds = array<i64: 256, 4>}, {pipeline_mode = #tpu.pipeline_mode<synchronous>, transform_indices = @transform_4, window_bounds = array<i64: 1, 4>}, {transform_indices = @transform_5, window_bounds = array<i64: 8, 4>}]} {
    %c0 = arith.constant 0 : index
    %c0_0 = arith.constant 0 : index
    %0 = vector.load %arg1[%c0, %c0_0] : memref<8x32xf32, #tpu.memory_space<vmem>>, vector<8x32xf32>
    %1 = arith.truncf %0 : vector<8x32xf32> to vector<8x32xbf16>
    %c0_1 = arith.constant 0 : index
    %c0_2 = arith.constant 0 : index
    %2 = vector.load %arg2[%c0_1, %c0_2] : memref<32x256xbf16, #tpu.memory_space<vmem>>, vector<32x256xbf16>
    %cst = arith.constant dense<0.000000e+00> : vector<8x256xf32>
    %3 = tpu.matmul %1, %2, %cst {dimension_numbers = #tpu.dot_dimension_numbers<[1], [0], [0], [1], [0, 0, 1, 1], [], []>} : vector<8x32xbf16>, vector<32x256xbf16>, vector<8x256xf32> -> vector<8x256xf32>
    %c0_3 = arith.constant 0 : index
    %c0_4 = arith.constant 0 : index
    %4 = vector.load %arg3[%c0_3, %c0_4] : memref<1x256xf32, #tpu.memory_space<vmem>>, vector<1x256xf32>
    %5 = vector.broadcast %4 : vector<1x256xf32> to vector<8x256xf32>
    %6 = arith.addf %3, %5 : vector<8x256xf32>
    %cst_5 = arith.constant 0.000000e+00 : f32
    %7 = vector.broadcast %cst_5 : f32 to vector<8x256xf32>
    %8 = arith.maximumf %6, %7 : vector<8x256xf32>
    %9 = arith.truncf %8 : vector<8x256xf32> to vector<8x256xbf16>
    %c0_6 = arith.constant 0 : index
    %c0_7 = arith.constant 0 : index
    %10 = vector.load %arg4[%c0_6, %c0_7] : memref<256x4xbf16, #tpu.memory_space<vmem>>, vector<256x4xbf16>
    %cst_8 = arith.constant dense<0.000000e+00> : vector<8x4xf32>
    %11 = tpu.matmul %9, %10, %cst_8 {dimension_numbers = #tpu.dot_dimension_numbers<[1], [0], [0], [1], [0, 0, 1, 1], [], []>} : vector<8x256xbf16>, vector<256x4xbf16>, vector<8x4xf32> -> vector<8x4xf32>
    %c0_9 = arith.constant 0 : index
    %c0_10 = arith.constant 0 : index
    %12 = vector.load %arg5[%c0_9, %c0_10] : memref<1x4xf32, #tpu.memory_space<vmem>>, vector<1x4xf32>
    %13 = vector.broadcast %12 : vector<1x4xf32> to vector<8x4xf32>
    %14 = arith.addf %11, %13 : vector<8x4xf32>
    %c0_11 = arith.constant 0 : index
    %c0_12 = arith.constant 0 : index
    %15 = vector.load %arg6[%c0_11, %c0_12] : memref<8x4xf32, #tpu.memory_space<vmem>>, vector<8x4xf32>
    tpu.vector_store %arg6[%c0_11, %c0_12], %14 {strides = array<i32>} : memref<8x4xf32, #tpu.memory_space<vmem>>, vector<8x4xf32>,
    return
  }
  func.func @transform_0(%arg0: i32) -> (i32, i32) {
    %c0_i32 = arith.constant 0 : i32
    %c0_i32_0 = arith.constant 0 : i32
    return %arg0, %c0_i32 : i32, i32
  }
  func.func @transform_1(%arg0: i32) -> (i32, i32) {
    %c0_i32 = arith.constant 0 : i32
    %c0_i32_0 = arith.constant 0 : i32
    %c0_i32_1 = arith.constant 0 : i32
    return %c0_i32, %c0_i32_0 : i32, i32
  }
  func.func @transform_2(%arg0: i32) -> (i32, i32) {
    %c0_i32 = arith.constant 0 : i32
    %c0_i32_0 = arith.constant 0 : i32
    %c0_i32_1 = arith.constant 0 : i32
    return %c0_i32, %c0_i32_0 : i32, i32
  }
  func.func @transform_3(%arg0: i32) -> (i32, i32) {
    %c0_i32 = arith.constant 0 : i32
    %c0_i32_0 = arith.constant 0 : i32
    %c0_i32_1 = arith.constant 0 : i32
    return %c0_i32, %c0_i32_0 : i32, i32
  }
  func.func @transform_4(%arg0: i32) -> (i32, i32) {
    %c0_i32 = arith.constant 0 : i32
    %c0_i32_0 = arith.constant 0 : i32
    %c0_i32_1 = arith.constant 0 : i32
    return %c0_i32, %c0_i32_0 : i32, i32
  }
  func.func @transform_5(%arg0: i32) -> (i32, i32) {
    %c0_i32 = arith.constant 0 : i32
    %c0_i32_0 = arith.constant 0 : i32
    return %arg0, %c0_i32 : i32, i32
  }
}

</mosaic_0001>

<bundles_post_ra>
// kernel: tpu_custom_call.1
= control target key start
LH: loop header
LB: loop body
LE: loop exit
PB: predicated region body
PF: predicated region fallthrough
CT: control target
= control target key end

     0   :  { %vm53_vm0 = vcmask 261120   ;;  %vm245_vm1 = vcmask 31744   ;;  %s468_s1 = inlined_call_operand.vmem [shape: bf16[32,256], index: 1, kind: input, shape index: {}]   ;;  %s469_s0 = inlined_call_operand.vmem [shape: f32[8,32], index: 0, kind: input, shape index: {}]   ;;  %s470_s3 = inlined_call_operand.vmem [shape: bf16[256,4], index: 3, kind: input, shape index: {}]   ;;  %s471_s4 = inlined_call_operand.vmem [shape: f32[1,4], index: 4, kind: input, shape index: {}]   ;;  %s472_s2 = inlined_call_operand.vmem [shape: f32[1,256], index: 2, kind: input, shape index: {}]   ;;  %s473_s5 = inlined_call_operand.vmem [shape: f32[8,4], index: 5, kind: output, shape index: {}]  }
   0x1   :  { %v261_v0 = vld [vmem:[%s468_s1 + $0x10] sm:$0xf]  ;;  %v336_v1 = vld [vmem:[%s468_s1 + $0x14] sm:$0xf0]  ;;  %v335_v2 = vld [vmem:[%s468_s1 + $0x14] sm:$0xf] }
   0x2   :  { %v262_v3 = vor.u32 %v336_v1, %v261_v0  ;;  %v263_v4 = vld [vmem:[%s468_s1 + $0x18] sm:$0xf0]  ;;  %v253_v5 = vld [vmem:[%s468_s1] sm:$0xf]  ;;  %v334_v6 = vld [vmem:[%s468_s1 + $0x4] sm:$0xf0] }
   0x3   :  { %v266_v7 = vor.u32 %v335_v2, %v263_v4  ;;  %v333_v8 = vld [vmem:[%s468_s1 + $0x4] sm:$0xf]  ;;  %v255_v9 = vld [vmem:[%s468_s1 + $0x8] sm:$0xf0]  ;;  %v254_v10 = vor.u32 %v334_v6, %v253_v5  ;;  %v344_v12 = vld [vmem:[%s470_s3 + $0x38] sm:$0xff] }
   0x4   :  { %63 = vmatpush.bf16.msra.mxu0 %v262_v3  ;;  %v21_v11 = vld [vmem:[%s469_s0] sm:$0xff]  ;;  %v352_v13 = vld [vmem:[%s470_s3 + $0x78] sm:$0xff]  ;;  %v258_v14 = vor.u32 %v333_v8, %v255_v9  ;;  %219 = vmatpush.bf16.msra.mxu2 %v344_v12  ;;  %v343_v15 = vld [vmem:[%s470_s3 + $0x30] sm:$0xff] }
   0x5   :  { %76 = vmatpush.bf16.msra.mxu1 %v266_v7  ;;  %232 = vmatpush.bf16.msra.mxu3 %v352_v13  ;;  %v351_v16 = vld [vmem:[%s470_s3 + $0x70] sm:$0xff]  ;;  %v22_v17 = vpack.c.bf16 %v21_v11, %v21_v11  ;;  %v342_v18 = vld [vmem:[%s470_s3 + $0x28] sm:$0xff]  ;;  %v341_v20 = vld [vmem:[%s470_s3 + $0x20] sm:$0xff] }
   0x6   :  { %v350_v19 = vld [vmem:[%s470_s3 + $0x68] sm:$0xff]  ;;  %v349_v21 = vld [vmem:[%s470_s3 + $0x60] sm:$0xff]  ;;  %v340_v22 = vld [vmem:[%s470_s3 + $0x18] sm:$0xff] }
   0x7   :  { %v348_v23 = vld [vmem:[%s470_s3 + $0x58] sm:$0xff]  ;;  %v339_v24 = vld [vmem:[%s470_s3 + $0x10] sm:$0xff]  ;;  %v338_v26 = vld [vmem:[%s470_s3 + $0x8] sm:$0xff] }
   0x8   :  { %64 = vmatpush.bf16.msra.mxu0 %v254_v10  ;;  %220 = vmatpush.bf16.msra.mxu2 %v343_v15  ;;  %v347_v25 = vld [vmem:[%s470_s3 + $0x50] sm:$0xff]  ;;  %v346_v27 = vld [vmem:[%s470_s3 + $0x48] sm:$0xff]  ;;  %v337_v28 = vld [vmem:[%s470_s3] sm:$0xff] }
   0x9   :  { %77 = vmatpush.bf16.msra.mxu1 %v258_v14  ;;  %233 = vmatpush.bf16.msra.mxu3 %v351_v16  ;;  %v345_v29 = vld [vmem:[%s470_s3 + $0x40] sm:$0xff] }
   0xa   :  { %v27_v30 = vld [vmem:[%s472_s2] sm:$0x3] }
   0xb   :  { %267 = vmatmul.msk.bf16.vlgmr.msra.gmra.mxu0 %vm53_vm0, %v22_v17  ;;  %v29_v31 = vperm.slane %v27_v30, 0  ;;  %v30_v32 = vperm.slane %v27_v30, 1  ;;  %v353_v43 = vld [vmem:[%s471_s4] ss:$0 sm:$0xff] }
   0xc   :  { %268 = vmatmul.msk.bf16.vlgmr.msra.gmra.mxu1 %vm53_vm0, %v22_v17  ;;  %221 = vmatpush.bf16.msra.mxu2 %v342_v18 }
   0xd   :  { %234 = vmatpush.bf16.msra.mxu3 %v350_v19 }
  0x10   :  { %222 = vmatpush.bf16.msra.mxu2 %v341_v20 }
  0x11   :  { %235 = vmatpush.bf16.msra.mxu3 %v349_v21 }
  0x14   :  { %223 = vmatpush.bf16.msra.mxu2 %v340_v22 }
  0x15   :  { %236 = vmatpush.bf16.msra.mxu3 %v348_v23 }
  0x18   :  { %224 = vmatpush.bf16.msra.mxu2 %v339_v24 }
  0x19   :  { %237 = vmatpush.bf16.msra.mxu3 %v347_v25 }
  0x1c   :  { %225 = vmatpush.bf16.msra.mxu2 %v338_v26 }
  0x1d   :  { %238 = vmatpush.bf16.msra.mxu3 %v346_v27 }
  0x20   :  { %226 = vmatpush.bf16.msra.mxu2 %v337_v28 }
  0x21   :  { %239 = vmatpush.bf16.msra.mxu3 %v345_v29 }
  0x88   :  { %v66_v33 = vpop.f32.mrf.mxu0 }
  0x89   :  { %v67_v34 = vadd.f32 %v66_v33, %v29_v31  ;;  %v79_v35 = vpop.f32.mrf.mxu1 }
  0x8a   :  { %v80_v36 = vadd.f32 %v79_v35, %v30_v32 }
  0x8b   :  { %v83_v37 = vmax.f32 %v67_v34, 0.0 }
  0x8c   :  { %v84_v38 = vmax.f32 %v80_v36, 0.0 }
  0x8d   :  { %v85_v39 = vpack.c.bf16 %v83_v37, %v83_v37 }
  0x8e   :  { %v86_v40 = vpack.c.bf16 %v84_v38, %v84_v38 }
  0x8f   :  { %227 = vmatmul.bf16.vlgmr.msra.gmra.mxu2 %v85_v39 }
  0x90   :  { %240 = vmatmul.bf16.vlgmr.msra.gmra.mxu3 %v86_v40  ;;  %v68_v41 = vpop.f32.mrf.mxu0 }
  0x91   :  { %v81_v42 = vpop.f32.mrf.mxu1 }
 0x112   :  { %v228_v44 = vpop.f32.mrf.mxu2 }
 0x113   :  { %v229_v45 = vadd.f32 %v353_v43, %v228_v44  ;;  %v241_v46 = vpop.f32.mrf.mxu3 }
 0x115   :  { %v242_v47 = vadd.f32 %v241_v46, %v229_v45 }
 0x117   :  { %246 = vst.msk [vmem:[%s473_s5] sm:$0xff] %vm245_vm1, %v242_v47 }
 0x11a   :  { %v230_v48 = vpop.f32.mrf.mxu2 }
 0x11b   :  { %v243_v49 = vpop.f32.mrf.mxu3 }

</bundles_post_ra>
